<compile_context>
chip_gen: v5e
topology: v5e:2x2
jax: 0.10.0
libtpu: 0.0.40
codegen_flags: <defaults>
</compile_context>

<pallas_src>
import jax
import jax.numpy as jnp
from jax.experimental import pallas as pl
from jax.experimental.pallas import tpu as pltpu

LANE = 128      # output / hidden last dims padded to multiples of 128
SUBLANE = 16    # covers bf16 sublane packing (8 would suffice for f32)


def _round_up(n: int, m: int) -> int:
    return ((n + m - 1) // m) * m


def _choose_batch_tile(B: int, block_b: int) -> int:
    """Batch tile: SUBLANE multiple, <= ~block_b, >=2 grid steps when possible,
    bounded padding waste for awkward B."""
    cap = min(block_b, _round_up(B, SUBLANE))
    if B >= 2 * SUBLANE:
        # Aim for at least 2 grid steps so 'parallel' spans both v7x TensorCores.
        cap = min(cap, _round_up(pl.cdiv(B, 2), SUBLANE))
    tb = max(SUBLANE, _round_up(cap, SUBLANE))
    # Shrink while batch-padding waste is large (avoid ~2x wasted work at e.g.
    # B just above a tile boundary).
    while tb > SUBLANE:
        waste = _round_up(B, tb) - B
        if waste <= max(SUBLANE, B // 8):
            break
        tb -= SUBLANE
    return tb


def mlp_kernel(x_ref, w1_ref, b1_ref, w2_ref, b2_ref, o_ref):
    # fc1: MXU matmul (bf16 in, f32 accumulate); bias add + ReLU on the VPU.
    h = jnp.dot(x_ref[...], w1_ref[...], preferred_element_type=jnp.float32)
    h = jnp.maximum(h + b1_ref[...], 0.0)
    # fc2: cast the activation back to the compute dtype so the second matmul
    # stays on the fast MXU path; accumulate in f32.
    y = jnp.dot(h.astype(w2_ref.dtype), w2_ref[...],
                preferred_element_type=jnp.float32)
    # Sigmoid: exp goes to the EUP; keep the exact divide (approx reciprocal
    # would trade output accuracy for a low-single-digit % VPU saving here).
    o_ref[...] = jax.nn.sigmoid(y + b2_ref[...]).astype(o_ref.dtype)


def prepare_params(w1, b1, w2, b2, *, compute_dtype=jnp.bfloat16):
    """One-time pad + cast of the parameters (hoisted out of the call path).

    w1: [D_in, H] (pre-transposed vs. PyTorch's [out, in]); b1: [H];
    w2: [H, D_out]; b2: [D_out].
    Returns (w1p [D_in, H_p] bf16, b1p [1, H_p] f32,
             w2p [H_p, D_out_p] bf16, b2p [1, D_out_p] f32).
    """
    d_in, hidden = w1.shape
    d_out = w2.shape[1]
    h_p = _round_up(hidden, LANE)
    d_out_p = _round_up(d_out, LANE)

    w1p = jnp.zeros((d_in, h_p), compute_dtype).at[:, :hidden].set(
        w1.astype(compute_dtype))
    w2p = jnp.zeros((h_p, d_out_p), compute_dtype).at[:hidden, :d_out].set(
        w2.astype(compute_dtype))
    b1p = jnp.zeros((1, h_p), jnp.float32).at[:, :hidden].set(
        b1.reshape(1, hidden).astype(jnp.float32))
    b2p = jnp.zeros((1, d_out_p), jnp.float32).at[:, :d_out].set(
        b2.reshape(1, d_out).astype(jnp.float32))
    return w1p, b1p, w2p, b2p


def simple_nn_forward(x, w1p, b1p, w2p, b2p, *, d_out, block_b=512,
                      compute_dtype=jnp.bfloat16):
    """Forward pass of SimpleNN using pre-padded parameters.

    x: [B, D_in] (unpadded);  params as returned by prepare_params.
    Returns [B, d_out] float32.
    """
    B, d_in = x.shape
    assert w1p.shape[0] == d_in, "w1p must match x's input dim"
    h_p = w1p.shape[1]
    d_out_p = w2p.shape[1]

    tb = _choose_batch_tile(B, block_b)
    b_p = _round_up(B, tb)
    grid = (b_p // tb,)

    # Only remaining per-call prep: cast (+ batch-pad if B is not a tile
    # multiple). allow_input_fusion below lets XLA fuse this producer into the
    # pallas_call instead of a separate HBM read+write of x.
    xc = x.astype(compute_dtype)
    if b_p != B:
        xc = jnp.pad(xc, ((0, b_p - B), (0, 0)))

    cd_bytes = jnp.dtype(compute_dtype).itemsize
    # VMEM budget: weights/biases single-buffered, x/out double-buffered.
    weight_bytes = (w1p.size + w2p.size) * cd_bytes + (b1p.size + b2p.size) * 4
    stream_bytes = 2 * tb * d_in * cd_bytes + 2 * tb * d_out_p * 4
    vmem_limit = int(min(100 * 2**20,
                         max(16 * 2**20, 2 * (weight_bytes + stream_bytes) + (1 << 20))))

    cost = pl.CostEstimate(
        flops=2 * b_p * (d_in * h_p + h_p * d_out_p),
        transcendentals=b_p * d_out_p,            # sigmoid -> exp on the EUP
        bytes_accessed=(xc.size * cd_bytes
                        + weight_bytes
                        + b_p * d_out_p * 4))

    out = pl.pallas_call(
        mlp_kernel,
        out_shape=jax.ShapeDtypeStruct((b_p, d_out_p), jnp.float32),
        grid_spec=pltpu.PrefetchScalarGridSpec(
            num_scalar_prefetch=0,
            grid=grid,
            in_specs=[
                # batch-streamed activations (last dim = full D_in, no lane pad)
                pl.BlockSpec((tb, d_in), lambda i: (i, 0)),
                # weights/biases pinned (constant index_map) + single-buffered
                pl.BlockSpec((d_in, h_p), lambda i: (0, 0),
                             pipeline_mode=pl.Buffered(1)),
                pl.BlockSpec((1, h_p), lambda i: (0, 0),
                             pipeline_mode=pl.Buffered(1)),
                pl.BlockSpec((h_p, d_out_p), lambda i: (0, 0),
                             pipeline_mode=pl.Buffered(1)),
                pl.BlockSpec((1, d_out_p), lambda i: (0, 0),
                             pipeline_mode=pl.Buffered(1)),
            ],
            # lane-dense output block -> full unmasked vst writeback
            out_specs=pl.BlockSpec((tb, d_out_p), lambda i: (i, 0)),
        ),
        compiler_params=pltpu.CompilerParams(
            # independent batch tiles -> shard across TensorCores (v7x megacore)
            dimension_semantics=("parallel",),
            # let XLA fuse the x cast/pad producer into the custom call
            allow_input_fusion=[True, False, False, False, False],
            vmem_limit_bytes=vmem_limit,
        ),
        cost_estimate=cost,
    )(xc, w1p, b1p, w2p, b2p)

    # Strip batch / output-lane padding.
    return out[:B, :d_out]


def init_params(key, input_dim, hidden_dim, output_dim):
    """Deterministic init mimicking nn.Linear's uniform(-1/sqrt(fan_in), +)."""
    k1, k2, k3, k4 = jax.random.split(key, 4)
    bound1 = 1.0 / jnp.sqrt(input_dim)
    bound2 = 1.0 / jnp.sqrt(hidden_dim)
    # Stored pre-transposed relative to PyTorch's [out_features, in_features].
    w1 = jax.random.uniform(k1, (input_dim, hidden_dim), jnp.float32, -bound1, bound1)
    b1 = jax.random.uniform(k2, (hidden_dim,), jnp.float32, -bound1, bound1)
    w2 = jax.random.uniform(k3, (hidden_dim, output_dim), jnp.float32, -bound2, bound2)
    b2 = jax.random.uniform(k4, (output_dim,), jnp.float32, -bound2, bound2)
    return w1, b1, w2, b2


def reference_forward_mixed(x, w1, b1, w2, b2, compute_dtype=jnp.bfloat16):
    """Reference mirroring the kernel's bf16-in / f32-accumulate numerics."""
    xc, w1c, w2c = (a.astype(compute_dtype) for a in (x, w1, w2))
    h = jnp.dot(xc, w1c, preferred_element_type=jnp.float32) + b1.reshape(1, -1)
    h = jnp.maximum(h, 0.0)
    y = jnp.dot(h.astype(compute_dtype), w2c,
                preferred_element_type=jnp.float32) + b2.reshape(1, -1)
    return jax.nn.sigmoid(y)


def reference_forward_f32(x, w1, b1, w2, b2):
    """Pure-f32 reference (PyTorch semantics)."""
    h = jnp.maximum(x @ w1 + b1.reshape(1, -1), 0.0)
    return jax.nn.sigmoid(h @ w2 + b2.reshape(1, -1))


if __name__ == "__main__":
    # Small shapes consistent with the module: batch=8, in=32, hidden=64, out=16.
    batch, input_dim, hidden_dim, output_dim = 8, 32, 64, 16

    key = jax.random.PRNGKey(0)
    kx, kp = jax.random.split(key)
    x = jax.random.normal(kx, (batch, input_dim), jnp.float32)
    w1, b1, w2, b2 = init_params(kp, input_dim, hidden_dim, output_dim)

    # Padding + casting of parameters happens ONCE, outside the call path.
    w1p, b1p, w2p, b2p = prepare_params(w1, b1, w2, b2)

    out = simple_nn_forward(x, w1p, b1p, w2p, b2p, d_out=output_dim)
    out = jax.block_until_ready(out)
    assert out.shape == (batch, output_dim)

    # Tight check vs. a reference with identical bf16/f32 mixed precision.
    ref_mixed = reference_forward_mixed(x, w1, b1, w2, b2)
    assert jnp.allclose(out, ref_mixed, atol=1e-4, rtol=1e-4), \
        "mismatch vs mixed-precision JAX reference"

    # Loose check vs. the pure-f32 PyTorch-semantics reference (bf16 rounding).
    ref_f32 = reference_forward_f32(x, w1, b1, w2, b2)
    assert jnp.allclose(out, ref_f32, atol=3e-2), \
        "mismatch vs f32 JAX reference"

    print("KERNEL_OK")
</pallas_src>

<mosaic_0001>
module attributes {stable_mosaic.version = 11 : i64} {
  func.func @mlp_kernel(%arg0: i32, %arg1: memref<16x32xbf16, #tpu.memory_space<vmem>>, %arg2: memref<32x128xbf16, #tpu.memory_space<vmem>>, %arg3: memref<1x128xf32, #tpu.memory_space<vmem>>, %arg4: memref<128x128xbf16, #tpu.memory_space<vmem>>, %arg5: memref<1x128xf32, #tpu.memory_space<vmem>>, %arg6: memref<16x128xf32, #tpu.memory_space<vmem>>) attributes {dimension_semantics = [#tpu.dimension_semantics<parallel>], iteration_bounds = array<i64: 1>, scalar_prefetch = 0 : i64, scratch_operands = 0 : i64, tpu.core_type = #tpu.core_type<tc>, window_params = [{transform_indices = @transform_0, window_bounds = array<i64: 16, 32>}, {pipeline_mode = #tpu.pipeline_mode<synchronous>, transform_indices = @transform_1, window_bounds = array<i64: 32, 128>}, {pipeline_mode = #tpu.pipeline_mode<synchronous>, transform_indices = @transform_2, window_bounds = array<i64: 1, 128>}, {pipeline_mode = #tpu.pipeline_mode<synchronous>, transform_indices = @transform_3, window_bounds = array<i64: 128, 128>}, {pipeline_mode = #tpu.pipeline_mode<synchronous>, transform_indices = @transform_4, window_bounds = array<i64: 1, 128>}, {transform_indices = @transform_5, window_bounds = array<i64: 16, 128>}]} {
    %c0 = arith.constant 0 : index
    %c0_0 = arith.constant 0 : index
    %0 = vector.load %arg1[%c0, %c0_0] : memref<16x32xbf16, #tpu.memory_space<vmem>>, vector<16x32xbf16>
    %c0_1 = arith.constant 0 : index
    %c0_2 = arith.constant 0 : index
    %1 = vector.load %arg2[%c0_1, %c0_2] : memref<32x128xbf16, #tpu.memory_space<vmem>>, vector<32x128xbf16>
    %cst = arith.constant dense<0.000000e+00> : vector<16x128xf32>
    %2 = tpu.matmul %0, %1, %cst {dimension_numbers = #tpu.dot_dimension_numbers<[1], [0], [0], [1], [0, 0, 1, 1], [], []>} : vector<16x32xbf16>, vector<32x128xbf16>, vector<16x128xf32> -> vector<16x128xf32>
    %c0_3 = arith.constant 0 : index
    %c0_4 = arith.constant 0 : index
    %3 = vector.load %arg3[%c0_3, %c0_4] : memref<1x128xf32, #tpu.memory_space<vmem>>, vector<1x128xf32>
    %4 = vector.broadcast %3 : vector<1x128xf32> to vector<16x128xf32>
    %5 = arith.addf %2, %4 : vector<16x128xf32>
    %cst_5 = arith.constant 0.000000e+00 : f32
    %6 = vector.broadcast %cst_5 : f32 to vector<16x128xf32>
    %7 = arith.maximumf %5, %6 : vector<16x128xf32>
    %8 = arith.truncf %7 : vector<16x128xf32> to vector<16x128xbf16>
    %c0_6 = arith.constant 0 : index
    %c0_7 = arith.constant 0 : index
    %9 = vector.load %arg4[%c0_6, %c0_7] : memref<128x128xbf16, #tpu.memory_space<vmem>>, vector<128x128xbf16>
    %cst_8 = arith.constant dense<0.000000e+00> : vector<16x128xf32>
    %10 = tpu.matmul %8, %9, %cst_8 {dimension_numbers = #tpu.dot_dimension_numbers<[1], [0], [0], [1], [0, 0, 1, 1], [], []>} : vector<16x128xbf16>, vector<128x128xbf16>, vector<16x128xf32> -> vector<16x128xf32>
    %c0_9 = arith.constant 0 : index
    %c0_10 = arith.constant 0 : index
    %11 = vector.load %arg5[%c0_9, %c0_10] : memref<1x128xf32, #tpu.memory_space<vmem>>, vector<1x128xf32>
    %12 = vector.broadcast %11 : vector<1x128xf32> to vector<16x128xf32>
    %13 = arith.addf %10, %12 : vector<16x128xf32>
    %14 = arith.negf %13 : vector<16x128xf32>
    %15 = math.exp %14 : vector<16x128xf32>
    %cst_11 = arith.constant 1.000000e+00 : f32
    %16 = vector.broadcast %cst_11 : f32 to vector<16x128xf32>
    %17 = arith.addf %16, %15 : vector<16x128xf32>
    %18 = arith.divf %16, %17 : vector<16x128xf32>
    %c0_12 = arith.constant 0 : index
    %c0_13 = arith.constant 0 : index
    %19 = vector.load %arg6[%c0_12, %c0_13] : memref<16x128xf32, #tpu.memory_space<vmem>>, vector<16x128xf32>
    tpu.vector_store %arg6[%c0_12, %c0_13], %18 {strides = array<i32>} : memref<16x128xf32, #tpu.memory_space<vmem>>, vector<16x128xf32>,
    return
  }
  func.func @transform_0(%arg0: i32) -> (i32, i32) {
    %c0_i32 = arith.constant 0 : i32
    %c0_i32_0 = arith.constant 0 : i32
    return %arg0, %c0_i32 : i32, i32
  }
  func.func @transform_1(%arg0: i32) -> (i32, i32) {
    %c0_i32 = arith.constant 0 : i32
    %c0_i32_0 = arith.constant 0 : i32
    %c0_i32_1 = arith.constant 0 : i32
    return %c0_i32, %c0_i32_0 : i32, i32
  }
  func.func @transform_2(%arg0: i32) -> (i32, i32) {
    %c0_i32 = arith.constant 0 : i32
    %c0_i32_0 = arith.constant 0 : i32
    %c0_i32_1 = arith.constant 0 : i32
    return %c0_i32, %c0_i32_0 : i32, i32
  }
  func.func @transform_3(%arg0: i32) -> (i32, i32) {
    %c0_i32 = arith.constant 0 : i32
    %c0_i32_0 = arith.constant 0 : i32
    %c0_i32_1 = arith.constant 0 : i32
    return %c0_i32, %c0_i32_0 : i32, i32
  }
  func.func @transform_4(%arg0: i32) -> (i32, i32) {
    %c0_i32 = arith.constant 0 : i32
    %c0_i32_0 = arith.constant 0 : i32
    %c0_i32_1 = arith.constant 0 : i32
    return %c0_i32, %c0_i32_0 : i32, i32
  }
  func.func @transform_5(%arg0: i32) -> (i32, i32) {
    %c0_i32 = arith.constant 0 : i32
    %c0_i32_0 = arith.constant 0 : i32
    return %arg0, %c0_i32 : i32, i32
  }
}

</mosaic_0001>

<bundles_post_ra>
// kernel: tpu_custom_call.1
= control target key start
LH: loop header
LB: loop body
LE: loop exit
PB: predicated region body
PF: predicated region fallthrough
CT: control target
= control target key end

     0   :  { %10 = vsyncpa [#allocation3], 0  ;;  %s493_s0 = inlined_call_operand.hbm [shape: bf16[16,32], index: 0, kind: input, shape index: {}]   ;;  %s494_s1 = inlined_call_operand.hbm [shape: bf16[32,128], index: 1, kind: input, shape index: {}]   ;;  %s495_s2 = inlined_call_operand.vmem [shape: f32[1,128], index: 2, kind: input, shape index: {}]   ;;  %s496_s3 = inlined_call_operand.hbm [shape: bf16[128,128], index: 3, kind: input, shape index: {}]   ;;  %s497_s4 = inlined_call_operand.vmem [shape: f32[1,128], index: 4, kind: input, shape index: {}]   ;;  %s498_s5 = inlined_call_operand.hbm [shape: f32[16,128], index: 5, kind: output, shape index: {}]  }
   0x1   :  { %11 = vsyncpa [#allocation6], 0 }
   0x2   :  { %12 = vsyncpa [#allocation4], 0  ;;  %s30_s20 = sshll.u32 %s494_s1, 4  ;;  %s437_s21 = smov [#allocation5]   ;;  %s31_s20 = int_to_ptr.hbm [resolvable:$true] %s30_s20 }
   0x3   :  { %s32_s22 = sshll.u32 %s437_s21, 4  ;;  %s17_s25 = sshll.u32 %s493_s0, 4  ;;  %s33_s22 = int_to_ptr.vmem [resolvable:$true] %s32_s22  ;;  %s18_s25 = int_to_ptr.hbm [resolvable:$true] %s17_s25 }
   0x4   :  { %s438_s26 = smov 64   ;;  %s439_s27 = smov 4  }
   0x5   :  { %38 = dma.hbm_to_vmem [thread:$0]  %s31_s20, 256, %s33_s22, [#allocation6], %s438_s26, %s438_s26, %s439_s27  }
   0x6   :  { %s440_s28 = smov [#allocation2]   ;;  %s45_s7 = sshll.u32 %s496_s3, 4  ;;  %s46_s7 = int_to_ptr.hbm [resolvable:$true] %s45_s7 }
   0x7   :  { %s19_s29 = sshll.u32 %s440_s28, 4  ;;  %s441_s1 = smov [#allocation7]   ;;  %s20_s29 = int_to_ptr.vmem [resolvable:$true] %s19_s29 }
   0x8   :  { %25 = dma.hbm_to_vmem [thread:$0]  %s18_s25, 128, %s20_s29, [#allocation3], %s438_s26, %s438_s26, %s439_s27  }
   0x9   :  { %s47_s8 = sshll.u32 %s441_s1, 4  ;;  %s48_s8 = int_to_ptr.vmem [resolvable:$true] %s47_s8 }
   0xa   :  { %53 = dma.hbm_to_vmem [thread:$0]  %s46_s7, 1024, %s48_s8, [#allocation6], %s438_s26, %s438_s26, %s439_s27  }
   0xb   :  { %431 = dma.done.wait [#allocation3], 128  }
   0xc   :  { %432 = vsyncadd [#allocation3], 4294967168 }
   0xd   :  { %433 = dma.done.wait [#allocation6], 1280  }
   0xe   :  { %434 = vsyncadd [#allocation6], 4294966016  ;;  %v308_v0 = vld [vmem:[#allocation5 + $0x8] sm:$0xff]  ;;  %v307_v2 = vld [vmem:[#allocation5] sm:$0xff]  ;;  %vm96_vm0 = vcmask 261120   ;;  %s245_s13 = sshll.u32 %s498_s5, 4  ;;  %s246_s13 = int_to_ptr.hbm [resolvable:$true] %s245_s13 }
   0xf   :  { %v316_v1 = vld [vmem:[#allocation7 + $0x38] sm:$0xff]  ;;  %106 = vmatpush.bf16.msra.mxu0 %v308_v0  ;;  %v315_v3 = vld [vmem:[#allocation7 + $0x30] sm:$0xff]  ;;  %v306_v4 = vld [vmem:[#allocation2] sm:$0xff]  ;;  %s443_s14 = smov 128   ;;  %s444_s15 = smov 8  }
  0x10   :  { %185 = vmatpush.bf16.msra.mxu1 %v316_v1  ;;  %v314_v5 = vld [vmem:[#allocation7 + $0x28] sm:$0xff]  ;;  %v313_v6 = vld [vmem:[#allocation7 + $0x20] sm:$0xff]  ;;  %v312_v7 = vld [vmem:[#allocation7 + $0x18] sm:$0xff] }
  0x11   :  { %v311_v8 = vld [vmem:[#allocation7 + $0x10] sm:$0xff]  ;;  %v310_v9 = vld [vmem:[#allocation7 + $0x8] sm:$0xff]  ;;  %v309_v10 = vld [vmem:[#allocation7] sm:$0xff] }
  0x12   :  { %v325_v12 = vld [vmem:[%s495_s2] ss:$0 sm:$0xff]  ;;  %s442_s2 = smov [#allocation8]  }
  0x13   :  { %107 = vmatpush.bf16.msra.mxu0 %v307_v2  ;;  %v326_v19 = vld [vmem:[%s497_s4] ss:$0 sm:$0xff]  ;;  %s243_s4 = sshll.u32 %s442_s2, 4  ;;  %s244_s4 = int_to_ptr.vmem [resolvable:$true] %s243_s4 }
  0x14   :  { %186 = vmatpush.bf16.msra.mxu1 %v315_v3 }
  0x16   :  { %271 = vmatmul.msk.bf16.vlgmr.msra.gmra.mxu0 %vm96_vm0, %v306_v4 }
  0x18   :  { %187 = vmatpush.bf16.msra.mxu1 %v314_v5 }
  0x1c   :  { %188 = vmatpush.bf16.msra.mxu1 %v313_v6 }
  0x20   :  { %189 = vmatpush.bf16.msra.mxu1 %v312_v7 }
  0x24   :  { %190 = vmatpush.bf16.msra.mxu1 %v311_v8 }
  0x28   :  { %191 = vmatpush.bf16.msra.mxu1 %v310_v9 }
  0x2c   :  { %192 = vmatpush.bf16.msra.mxu1 %v309_v10 }
  0x93   :  { %v109_v11 = vpop.f32.mrf.mxu0 }
  0x94   :  { %v110_v13 = vadd.f32 %v325_v12, %v109_v11 }
  0x96   :  { %v114_v16 = vmax.f32 %v110_v13, 0.0 }
  0x9b   :  { %v111_v14 = vpop.f32.mrf.mxu0 }
  0x9c   :  { %v112_v15 = vadd.f32 %v325_v12, %v111_v14 }
  0x9e   :  { %v115_v17 = vmax.f32 %v112_v15, 0.0 }
  0xa0   :  { %v116_v18 = vpack.c.bf16 %v115_v17, %v114_v16 }
  0xa2   :  { %193 = vmatmul.bf16.vlgmr.msra.gmra.mxu1 %v116_v18 }
 0x11f   :  { %v194_v20 = vpop.f32.mrf.mxu1 }
 0x120   :  { %v195_v21 = vadd.f32 %v326_v19, %v194_v20 }
 0x122   :  { %v304_v22 = vmul.f32 -1.442695, %v195_v21 }
 0x124   :  { %327 = vpow2.f32 %v304_v22 }
 0x127   :  { %v196_v23 = vpop.f32.mrf.mxu1 }
 0x128   :  { %v197_v24 = vadd.f32 %v326_v19, %v196_v23 }
 0x12a   :  { %v328_v25 = vpop.eup %327  ;;  %v305_v26 = vmul.f32 -1.442695, %v197_v24 }
 0x12b   :  { %v205_v27 = vadd.f32 1.0, %v328_v25 }
 0x12c   :  { %329 = vpow2.f32 %v305_v26 }
 0x12d   :  { %331 = vrcp.f32 %v205_v27  ;;  %v218_v33 = vand.u32 2147483648, %v205_v27  ;;  %v216_v35 = vand.u32 2147483647, %v205_v27  ;;  %vm212_vm2 = vweird.f32 %v205_v27 }
 0x12f   :  { %v219_v38 = vor.u32 1.1754944e-38, %v218_v33  ;;  %vm217_vm4 = vcmp.eq.f32.partialorder %v216_v35, 8.507059e+37 }
 0x132   :  { %v330_v28 = vpop.eup %329 }
 0x133   :  { %v332_v29 = vpop.eup %331  ;;  %v206_v30 = vadd.f32 1.0, %v330_v28 }
 0x134   :  { %v208_v31 = vmul.f32 %v332_v29, %v205_v27  ;;  %vm213_vm1 = vweird.f32 %v332_v29 }
 0x135   :  { %333 = vrcp.f32 %v206_v30  ;;  %vm214_vm3 = vmor %vm212_vm2, %vm213_vm1  ;;  %v233_v43 = vand.u32 2147483648, %v206_v30  ;;  %v231_v45 = vand.u32 2147483647, %v206_v30  ;;  %vm227_vm6 = vweird.f32 %v206_v30 }
 0x136   :  { %v209_v32 = vsub.f32 1.0, %v208_v31 }
 0x137   :  { %v234_v47 = vor.u32 1.1754944e-38, %v233_v43  ;;  %vm232_vm8 = vcmp.eq.f32.partialorder %v231_v45, 8.507059e+37 }
 0x138   :  { %v210_v34 = vmul.f32 %v332_v29, %v209_v32 }
 0x13a   :  { %v211_v36 = vadd.f32 %v332_v29, %v210_v34 }
 0x13b   :  { %v334_v37 = vpop.eup %333 }
 0x13c   :  { %v223_v39 = vmul.f32 %v334_v37, %v206_v30  ;;  %v215_v40 = vsel %vm214_vm3, %v332_v29, %v211_v36  ;;  %vm228_vm5 = vweird.f32 %v334_v37 }
 0x13d   :  { %v220_v41 = vsel %vm217_vm4, %v219_v38, %v215_v40  ;;  %vm229_vm7 = vmor %vm227_vm6, %vm228_vm5 }
 0x13e   :  { %v224_v42 = vsub.f32 1.0, %v223_v39  ;;  %237 = vst [vmem:[#allocation8] sm:$0xff] %v220_v41 }
 0x140   :  { %v225_v44 = vmul.f32 %v334_v37, %v224_v42 }
 0x142   :  { %v226_v46 = vadd.f32 %v334_v37, %v225_v44 }
 0x144   :  { %v230_v48 = vsel %vm229_vm7, %v334_v37, %v226_v46 }
 0x145   :  { %v235_v49 = vsel %vm232_vm8, %v234_v47, %v230_v48 }
 0x146   :  { %238 = vst [vmem:[#allocation8 + $0x8] sm:$0xff] %v235_v49 }
 0x147   :  { %251 = dma.vmem_to_hbm [thread:$0]  %s244_s4, 256, %s246_s13, [#allocation4], %s443_s14, %s443_s14, %s444_s15  }
 0x148   :  { %435 = dma.done.wait [#allocation4], 256  }
 0x149   :  { %436 = vsyncadd [#allocation4], 4294967040 }
 0x14a   :  { %256 = vsyncpa [#allocation3], 1 }
 0x14b   :  { %257 = vsyncpa [#allocation6], 1 }
 0x14c   :  { %258 = vsyncpa [#allocation4], 1 }

</bundles_post_ra>
